<compile_context>
chip_gen: v6e
topology: v6e:2x2x1
jax: 0.10.0
libtpu: 0.0.40
codegen_flags: <defaults>
</compile_context>

<pallas_src>
import jax
import jax.numpy as jnp
from jax.experimental import pallas as pl
from jax.experimental.pallas import tpu as pltpu

PADDING = 1  # module hard-codes self.padding = 1 regardless of ctor arg

_VMEM_LIMIT_BYTES = 32 * 1024 * 1024  # safe on v5e/v6e (128 MiB phys) and v7x (64 MiB/TC)


def _permute_pad_kernel(x_ref, o_ref):
    # x_ref: (block_rows, L) in VMEM; o_ref: (block_rows, L + 2*PADDING) in VMEM.
    x = x_ref[...]
    # One lane-dense full-block store starting at lane 0 (only the final partial vreg
    # per row-group is masked); the circular edges are merged in vregs, not via
    # separate misaligned width-1 stores.
    o_ref[...] = jnp.concatenate([x[:, -PADDING:], x, x[:, :PADDING]], axis=-1)


def _round_up(v, m):
    return -(-v // m) * m


def _choose_block_rows(rows, length, itemsize):
    """Row-block size: sublane-aligned, ~4 MiB of input per block, >=2 blocks if legal."""
    sublane = {4: 8, 2: 16, 1: 32}.get(itemsize, 8)
    target_bytes = 4 * 1024 * 1024
    per_row_bytes = max(length * itemsize, 1)
    target_rows = max(sublane, (target_bytes // per_row_bytes) // sublane * sublane)
    # Prefer at least 2 balanced grid steps so v7x's second TensorCore gets work,
    # and re-balance so the last block isn't a sliver. Hard layout constraint:
    # block_rows % 8 == 0 (sublane is a multiple of 8) OR block_rows == rows.
    n_blocks = max(2, pl.cdiv(rows, target_rows))
    block_rows = _round_up(pl.cdiv(rows, n_blocks), sublane)
    if block_rows >= rows:
        return rows  # single full-extent block (always layout-legal)
    return block_rows


def permute_pad(x, block_rows=None):
    """Circular pad of width PADDING on the last axis of a (N, C, L) array."""
    N, C, L = x.shape
    itemsize = jnp.dtype(x.dtype).itemsize
    rows = N * C
    Lp = L + 2 * PADDING

    if block_rows is None:
        block_rows = _choose_block_rows(rows, L, itemsize)

    # VMEM guard: in+out blocks, each double-buffered, must fit the scoped budget
    # with headroom. Only trips for very long L (f32 L ~ 200k+).
    block_vmem_bytes = 2 * block_rows * (L + Lp) * itemsize
    if block_vmem_bytes > _VMEM_LIMIT_BYTES - (4 << 20):
        # TODO(synk): add an L-axis grid (edge columns via pl.when on the first/last
        # L-tile) or a manual-DMA path for very long sequences; XLA fallback for now.
        return jnp.concatenate([x[:, :, -PADDING:], x, x[:, :, :PADDING]], axis=2)

    # Flatten (N, C) into one row axis so blocks are deep on the sublane axis and the
    # ~0.35 us per-grid-step overhead is amortized over megabytes.
    x2 = x.reshape(rows, L)
    grid = (pl.cdiv(rows, block_rows),)

    cost = pl.CostEstimate(
        flops=0,
        transcendentals=0,
        bytes_accessed=rows * (L + Lp) * itemsize,
    )

    out2 = pl.pallas_call(
        _permute_pad_kernel,
        out_shape=jax.ShapeDtypeStruct((rows, Lp), x.dtype),
        grid=grid,
        in_specs=[pl.BlockSpec((block_rows, L), lambda i: (i, 0))],
        out_specs=pl.BlockSpec((block_rows, Lp), lambda i: (i, 0)),
        compiler_params=pltpu.CompilerParams(
            dimension_semantics=("parallel",),
            vmem_limit_bytes=_VMEM_LIMIT_BYTES,
        ),
        cost_estimate=cost,
    )(x2)

    return out2.reshape(N, C, Lp)


def permute_pad_ref(x):
    # Pure-JAX reference matching the PyTorch forward exactly.
    return jnp.concatenate([x[:, :, -PADDING:], x, x[:, :, :PADDING]], axis=2)


if __name__ == "__main__":
    key = jax.random.PRNGKey(0)

    # 1) Small NCL shape consistent with a Conv1d-style input: batch=2, channels=4, length=16.
    x = jax.random.normal(key, (2, 4, 16), dtype=jnp.float32)
    out = jax.block_until_ready(permute_pad(x))
    ref = permute_pad_ref(x)
    assert out.shape == (2, 4, 16 + 2 * PADDING), out.shape
    assert out.dtype == x.dtype
    assert jnp.array_equal(out, ref), "Pallas output mismatch vs reference (f32, single block)"

    # 2) bf16, odd row count (rows == 15 -> single full-extent block path).
    xb = jax.random.normal(jax.random.PRNGKey(0), (3, 5, 16), dtype=jnp.bfloat16)
    outb = jax.block_until_ready(permute_pad(xb))
    assert jnp.array_equal(outb, permute_pad_ref(xb)), "Pallas output mismatch vs reference (bf16)"

    # 3) Multi-block ragged grid: rows = 24, block_rows = 16 -> grid of 2 with a
    #    partial (8-row) last block; exercises masked writeback of the last block.
    xm = jax.random.normal(jax.random.PRNGKey(0), (3, 8, 16), dtype=jnp.float32)
    outm = jax.block_until_ready(permute_pad(xm))
    assert jnp.array_equal(outm, permute_pad_ref(xm)), "Pallas output mismatch vs reference (ragged grid)"

    # 4) Explicitly forced small block size -> 3 balanced blocks over 24 rows.
    outf = jax.block_until_ready(permute_pad(xm, block_rows=8))
    assert jnp.array_equal(outf, permute_pad_ref(xm)), "Pallas output mismatch vs reference (forced blocks)"

    print("KERNEL_OK")
</pallas_src>

<mosaic_0001>
module attributes {stable_mosaic.version = 11 : i64} {
  func.func @_permute_pad_kernel(%arg0: i32, %arg1: memref<8x16xf32, #tpu.memory_space<vmem>>, %arg2: memref<8x18xf32, #tpu.memory_space<vmem>>) attributes {dimension_semantics = [#tpu.dimension_semantics<parallel>], iteration_bounds = array<i64: 1>, scalar_prefetch = 0 : i64, scratch_operands = 0 : i64, tpu.core_type = #tpu.core_type<tc>, window_params = [{transform_indices = @transform_0, window_bounds = array<i64: 8, 16>}, {transform_indices = @transform_1, window_bounds = array<i64: 8, 18>}]} {
    %c0 = arith.constant 0 : index
    %c0_0 = arith.constant 0 : index
    %0 = vector.load %arg1[%c0, %c0_0] : memref<8x16xf32, #tpu.memory_space<vmem>>, vector<8x16xf32>
    %1 = vector.extract_strided_slice %0 {offsets = [0, 15], sizes = [8, 1], strides = [1, 1]} : vector<8x16xf32> to vector<8x1xf32>
    %2 = vector.extract_strided_slice %0 {offsets = [0, 0], sizes = [8, 1], strides = [1, 1]} : vector<8x16xf32> to vector<8x1xf32>
    %3 = tpu.concatenate %1, %0, %2 in 1 : vector<8x1xf32>, vector<8x16xf32>, vector<8x1xf32> -> vector<8x18xf32>
    %c0_1 = arith.constant 0 : index
    %c0_2 = arith.constant 0 : index
    %4 = vector.load %arg2[%c0_1, %c0_2] : memref<8x18xf32, #tpu.memory_space<vmem>>, vector<8x18xf32>
    tpu.vector_store %arg2[%c0_1, %c0_2], %3 {strides = array<i32>} : memref<8x18xf32, #tpu.memory_space<vmem>>, vector<8x18xf32>,
    return
  }
  func.func @transform_0(%arg0: i32) -> (i32, i32) {
    %c0_i32 = arith.constant 0 : i32
    %c0_i32_0 = arith.constant 0 : i32
    return %arg0, %c0_i32 : i32, i32
  }
  func.func @transform_1(%arg0: i32) -> (i32, i32) {
    %c0_i32 = arith.constant 0 : i32
    %c0_i32_0 = arith.constant 0 : i32
    return %arg0, %c0_i32 : i32, i32
  }
}

</mosaic_0001>

<bundles_post_ra>
// kernel: tpu_custom_call.1
= control target key start
LH: loop header
LB: loop body
LE: loop exit
PB: predicated region body
PF: predicated region fallthrough
CT: control target
= control target key end

     0   :  { %6 = vsyncpa [#allocation3], 0  ;;  %s123_s0 = inlined_call_operand.hbm [shape: f32[8,16], index: 0, kind: input, shape index: {}]   ;;  %s124_s1 = inlined_call_operand.hbm [shape: f32[8,18], index: 1, kind: output, shape index: {}]  }
   0x1   :  { %7 = vsyncpa [#allocation4], 0  ;;  %s102_s6 = smov [#allocation2]  }
   0x2   :  { %s14_s7 = sshll.u32 %s102_s6, 4  ;;  %s15_s7 = int_to_ptr.vmem [resolvable:$true] %s14_s7 }
   0x3   :  { %s66_s8 = scalar_lea.vmem %s15_s7, 128  ;;  %p71_p1 = scmp.lt.s32.totalorder %s15_s7, %s15_s7 }
   0x4   :  { %p67_p0 = scmp.ne.s32.totalorder %s15_s7, %s66_s8  ;;  %p72_p2 = scmp.lt.s32.totalorder %s66_s8, %s66_s8 }
   0x6   :  { %p73_p3 = por %p72_p2, %p71_p1 }
   0x8   :  { %p74_p4 = pnand %p73_p3, %p67_p0 }
   0xa   :  { %77 = shalt.err (!%p74_p4)
}
   0xb   :  { %17 = dma.hbm_to_vmem [thread:$0]  %s123_s0, 128, %s15_s7, [#allocation3]  }
   0xc   :  { %98 = dma.done.wait [#allocation3], 128  }
   0xd   :  { %99 = vsyncadd [#allocation3], 4294967168  ;;  %v21_v0 = vld [vmem:[#allocation2] sm:$0xff]  ;;  %s103_s11 = smov 113   ;;  %s104_s12 = smov 17   ;;  %vm32_vm0 = vcmask 7168  }
   0xe   :  { %23 = vrot.lane.b32.xlu0 %v21_v0, %s103_s11  ;;  %29 = vrot.lane.b32.xlu1 %v21_v0, %s104_s12  ;;  %s105_s13 = smov 1   ;;  %s106_s14 = smov [#allocation5]   ;;  %vm34_vm1 = vcmask 138240   ;;  %vm36_vm2 = vcmask 146432  }
   0xf   :  { %s44_s15 = sshll.u32 %s106_s14, 4  ;;  %s45_s15 = int_to_ptr.vmem [resolvable:$true] %s44_s15 }
  0x10   :  { %s78_s0 = scalar_lea.vmem %s45_s15, 128  ;;  %p83_p6 = scmp.lt.s32.totalorder %s45_s15, %s45_s15 }
  0x11   :  { %p79_p5 = scmp.ne.s32.totalorder %s45_s15, %s78_s0  ;;  %p84_p7 = scmp.lt.s32.totalorder %s78_s0, %s78_s0 }
  0x12   :  { %26 = vrot.lane.b32.xlu0 %v21_v0, %s105_s13 }
  0x13   :  { %p85_p8 = por %p84_p7, %p83_p6 }
  0x15   :  { %p86_p9 = pnand %p85_p8, %p79_p5 }
  0x80   :  { %v24_v1 = vpop.permute.xlu0 %23  ;;  %v30_v2 = vpop.permute.xlu1 %29 }
  0x84   :  { %v27_v3 = vpop.permute.xlu0 %26 }
  0x85   :  { %v33_v4 = vsel %vm32_vm0, %v24_v1, %v27_v3 }
  0x86   :  { %v35_v5 = vsel %vm34_vm1, %v33_v4, %v30_v2 }
  0x87   :  { %37 = vst.msk [vmem:[#allocation5] sm:$0xff] %vm36_vm2, %v35_v5 }
  0x88   :  { %89 = shalt.err (!%p86_p9)
}
  0x89   :  { %47 = dma.vmem_to_hbm [thread:$0]  %s45_s15, 128, %s124_s1, [#allocation4]  }
  0x8a   :  { %100 = dma.done.wait [#allocation4], 128  }
  0x8b   :  { %101 = vsyncadd [#allocation4], 4294967168 }
  0x8c   :  { %51 = vsyncpa [#allocation3], 1 }
  0x8d   :  { %52 = vsyncpa [#allocation4], 1 }

</bundles_post_ra>
